<compile_context>
chip_gen: v7x
topology: tpu7x:2x2x1
jax: 0.10.0
libtpu: 0.0.40
codegen_flags: <defaults>
</compile_context>

<pallas_src>
import jax
import jax.numpy as jnp
import numpy as np
from jax.experimental import pallas as pl
from jax.experimental.pallas import tpu as pltpu


def _round_up(a: int, b: int) -> int:
    return ((a + b - 1) // b) * b


def attention_kernel(x_ref, prm_ref, y_ref):
    """One grid step processes a (TB, D, M) batch-block of samples.

    x_ref:   (TB, D, M) input block
    prm_ref: (3, D, 1)  fused float32 parameters [diag(W_a); b_a; v]
    y_ref:   (TB, D)    output block
    """
    x = x_ref[...]                                     # (TB, D, M)
    prm = prm_ref[...]                                 # (3, D, 1) float32
    w_diag = prm[0:1]                                  # (1, D, 1)
    b_a = prm[1:2]                                     # (1, D, 1)
    v = prm[2:3]                                       # (1, D, 1)

    # S[n,d,m] = tanh(x[n,d,m] * W_a[d,d] + b_a[d])   (promotes to f32)
    s = jnp.tanh(x * w_diag + b_a)                     # (TB, D, M) f32

    # score[n,m] = sum_d S[n,d,m] * v[d]   (cross-sublane reduce)
    score = jnp.sum(s * v, axis=1, keepdims=True)      # (TB, 1, M) f32

    # Numerically-stable softmax over m. The block always holds the FULL M
    # extent, so max/sum are exact (no online-softmax accumulator needed).
    score = score - jnp.max(score, axis=2, keepdims=True)
    e = jnp.exp(score)                                 # (TB, 1, M)
    z = jnp.sum(e, axis=2, keepdims=True)              # (TB, 1, 1)
    a = e * pl.reciprocal(z)                           # (TB, 1, M)

    # Y[n,d] = sum_m A[n,m] * x[n,d,m]   (cross-lane reduce)
    y_ref[...] = jnp.sum(a * x, axis=2).astype(y_ref.dtype)   # (TB, D)


def attention_forward(x, W_a, b_a, v, *, block_rows=None):
    """x: (N, D, M); W_a: (D, D); b_a: (D,); v: (D, 1)  ->  Y: (N, D)."""
    N, D, M = x.shape

    # ---- batch-block sizing --------------------------------------------------
    # Batch many samples per step to amortize the ~0.35 us/step pipeline cost
    # while keeping each (lane-padded) x buffer around 4 MiB. Worst-case VMEM:
    #   2 x 4 MiB (double-buffered x) + ~2 x 4 MiB f32 intermediates  < 32 MiB.
    if block_rows is None:
        padded_row_bytes = D * _round_up(M, 128) * 4   # f32 compute footprint
        block_rows = (4 * 1024 * 1024) // max(padded_row_bytes, 1)
        block_rows = max(8, min(512, (block_rows // 8) * 8))
    TB = min(block_rows, _round_up(N, 8))
    Npad = _round_up(N, TB)

    # Zero-pad the batch to a multiple of TB (padding rows give Y = 0, no NaNs).
    x_p = x if Npad == N else jnp.pad(x, ((0, Npad - N), (0, 0), (0, 0)))

    # ---- fused parameters ----------------------------------------------------
    # einsum('ndm,dd->ndm', x, W_a) only uses diag(W_a); pack [diag(W_a); b_a; v]
    # into a single (3, D, 1) column block -> one small constant DMA per step.
    params = jnp.stack(
        [jnp.diagonal(W_a), b_a.reshape(D), v.reshape(D)], axis=0
    ).reshape(3, D, 1).astype(jnp.float32)

    grid = (Npad // TB,)
    y = pl.pallas_call(
        attention_kernel,
        out_shape=jax.ShapeDtypeStruct((Npad, D), x.dtype),
        grid_spec=pltpu.PrefetchScalarGridSpec(
            num_scalar_prefetch=0,
            grid=grid,
            in_specs=[
                pl.BlockSpec((TB, D, M), lambda i: (i, 0, 0)),
                pl.BlockSpec((3, D, 1), lambda i: (0, 0, 0)),
            ],
            out_specs=pl.BlockSpec((TB, D), lambda i: (i, 0)),
        ),
        compiler_params=pltpu.CompilerParams(
            # batch axis is embarrassingly parallel -> megacore sharding
            dimension_semantics=("parallel",),
            vmem_limit_bytes=32 * 1024 * 1024,
        ),
    )(x_p, params)
    return y[:N]


def _reference(x, W_a, b_a, v):
    """Pure-JAX (elementwise) reference of the PyTorch forward pass."""
    wdiag = jnp.diagonal(W_a)
    s = jnp.tanh(x * wdiag[None, :, None] + b_a[None, :, None])
    score = jnp.sum(s * v[None, :, 0:1], axis=1)       # (N, M)
    a = jax.nn.softmax(score, axis=1)
    return jnp.sum(a[:, None, :] * x, axis=2)          # (N, D)


if __name__ == "__main__":
    key = jax.random.PRNGKey(0)
    k_x, k_w, k_v, k_x2 = jax.random.split(key, 4)

    N, D, M = 2, 32, 16  # batch, feature_dim, positions

    x = jax.random.normal(k_x, (N, D, M), dtype=jnp.float32)

    # deterministic parameter init matching the module's __init__
    bound_w = float(np.sqrt(6.0 / (D + D)))            # xavier_uniform for (D, D)
    W_a = jax.random.uniform(k_w, (D, D), minval=-bound_w, maxval=bound_w,
                             dtype=jnp.float32)
    bound_v = float(np.sqrt(6.0 / (D + 1)))            # xavier_uniform for (D, 1)
    v = jax.random.uniform(k_v, (D, 1), minval=-bound_v, maxval=bound_v,
                           dtype=jnp.float32)
    b_a = jnp.zeros((D,), dtype=jnp.float32)           # zeros_

    y = attention_forward(x, W_a, b_a, v)
    jax.block_until_ready(y)
    y_ref = _reference(x, W_a, b_a, v)
    assert y.shape == (N, D)
    assert np.allclose(np.asarray(y), np.asarray(y_ref), atol=1e-5, rtol=1e-5), \
        "Pallas kernel mismatch vs reference"

    # Exercise the multi-block + padding path (grid of 3 blocks of 8 rows).
    N2 = 20
    x2 = jax.random.normal(k_x2, (N2, D, M), dtype=jnp.float32)
    y2 = attention_forward(x2, W_a, b_a, v, block_rows=8)
    jax.block_until_ready(y2)
    y2_ref = _reference(x2, W_a, b_a, v)
    assert y2.shape == (N2, D)
    assert np.allclose(np.asarray(y2), np.asarray(y2_ref), atol=1e-5, rtol=1e-5), \
        "Pallas kernel mismatch vs reference (multi-block path)"

    print("KERNEL_OK")
</pallas_src>

<mosaic_0001>
module attributes {stable_mosaic.version = 11 : i64} {
  func.func @attention_kernel(%arg0: i32, %arg1: memref<8x32x16xf32, #tpu.memory_space<vmem>>, %arg2: memref<3x32x1xf32, #tpu.memory_space<vmem>>, %arg3: memref<8x32xf32, #tpu.memory_space<vmem>>) attributes {dimension_semantics = [#tpu.dimension_semantics<parallel>], iteration_bounds = array<i64: 1>, scalar_prefetch = 0 : i64, scratch_operands = 0 : i64, tpu.core_type = #tpu.core_type<tc>, window_params = [{transform_indices = @transform_0, window_bounds = array<i64: 8, 32, 16>}, {pipeline_mode = #tpu.pipeline_mode<synchronous>, transform_indices = @transform_1, window_bounds = array<i64: 3, 32, 1>}, {transform_indices = @transform_2, window_bounds = array<i64: 8, 32>}]} {
    %c0 = arith.constant 0 : index
    %c0_0 = arith.constant 0 : index
    %c0_1 = arith.constant 0 : index
    %0 = vector.load %arg1[%c0, %c0_0, %c0_1] : memref<8x32x16xf32, #tpu.memory_space<vmem>>, vector<8x32x16xf32>
    %c0_2 = arith.constant 0 : index
    %c0_3 = arith.constant 0 : index
    %c0_4 = arith.constant 0 : index
    %1 = vector.load %arg2[%c0_2, %c0_3, %c0_4] : memref<3x32x1xf32, #tpu.memory_space<vmem>>, vector<3x32x1xf32>
    %2 = vector.extract_strided_slice %1 {offsets = [0, 0, 0], sizes = [1, 32, 1], strides = [1, 1, 1]} : vector<3x32x1xf32> to vector<1x32x1xf32>
    %3 = vector.extract_strided_slice %1 {offsets = [1, 0, 0], sizes = [1, 32, 1], strides = [1, 1, 1]} : vector<3x32x1xf32> to vector<1x32x1xf32>
    %4 = vector.extract_strided_slice %1 {offsets = [2, 0, 0], sizes = [1, 32, 1], strides = [1, 1, 1]} : vector<3x32x1xf32> to vector<1x32x1xf32>
    %5 = vector.broadcast %2 : vector<1x32x1xf32> to vector<8x32x16xf32>
    %6 = arith.mulf %0, %5 : vector<8x32x16xf32>
    %7 = vector.broadcast %3 : vector<1x32x1xf32> to vector<8x32x16xf32>
    %8 = arith.addf %6, %7 : vector<8x32x16xf32>
    %9 = math.tanh %8 : vector<8x32x16xf32>
    %10 = vector.broadcast %4 : vector<1x32x1xf32> to vector<8x32x16xf32>
    %11 = arith.mulf %9, %10 : vector<8x32x16xf32>
    %cst = arith.constant dense<0.000000e+00> : vector<8x16xf32>
    %12 = vector.multi_reduction <add>, %11, %cst [1] : vector<8x32x16xf32> to vector<8x16xf32>
    %13 = vector.shape_cast %12 : vector<8x16xf32> to vector<8x1x16xf32>
    %cst_5 = arith.constant dense<0xFF800000> : vector<8x1xf32>
    %14 = vector.multi_reduction <maximumf>, %13, %cst_5 [2] : vector<8x1x16xf32> to vector<8x1xf32>
    %15 = vector.shape_cast %14 : vector<8x1xf32> to vector<8x1x1xf32>
    %16 = vector.broadcast %15 : vector<8x1x1xf32> to vector<8x1x16xf32>
    %17 = arith.subf %13, %16 : vector<8x1x16xf32>
    %18 = math.exp %17 : vector<8x1x16xf32>
    %cst_6 = arith.constant dense<0.000000e+00> : vector<8x1xf32>
    %19 = vector.multi_reduction <add>, %18, %cst_6 [2] : vector<8x1x16xf32> to vector<8x1xf32>
    %20 = vector.shape_cast %19 : vector<8x1xf32> to vector<8x1x1xf32>
    %21 = tpu.reciprocal %20 : vector<8x1x1xf32> -> vector<8x1x1xf32>
    %22 = vector.broadcast %21 : vector<8x1x1xf32> to vector<8x1x16xf32>
    %23 = arith.mulf %18, %22 : vector<8x1x16xf32>
    %24 = vector.broadcast %23 : vector<8x1x16xf32> to vector<8x32x16xf32>
    %25 = arith.mulf %24, %0 : vector<8x32x16xf32>
    %cst_7 = arith.constant dense<0.000000e+00> : vector<8x32xf32>
    %26 = vector.multi_reduction <add>, %25, %cst_7 [2] : vector<8x32x16xf32> to vector<8x32xf32>
    %c0_8 = arith.constant 0 : index
    %c0_9 = arith.constant 0 : index
    %27 = vector.load %arg3[%c0_8, %c0_9] : memref<8x32xf32, #tpu.memory_space<vmem>>, vector<8x32xf32>
    tpu.vector_store %arg3[%c0_8, %c0_9], %26 {strides = array<i32>} : memref<8x32xf32, #tpu.memory_space<vmem>>, vector<8x32xf32>,
    return
  }
  func.func @transform_0(%arg0: i32) -> (i32, i32, i32) {
    %c0_i32 = arith.constant 0 : i32
    %c0_i32_0 = arith.constant 0 : i32
    %c0_i32_1 = arith.constant 0 : i32
    return %arg0, %c0_i32, %c0_i32_0 : i32, i32, i32
  }
  func.func @transform_1(%arg0: i32) -> (i32, i32, i32) {
    %c0_i32 = arith.constant 0 : i32
    %c0_i32_0 = arith.constant 0 : i32
    %c0_i32_1 = arith.constant 0 : i32
    %c0_i32_2 = arith.constant 0 : i32
    return %c0_i32, %c0_i32_0, %c0_i32_1 : i32, i32, i32
  }
  func.func @transform_2(%arg0: i32) -> (i32, i32) {
    %c0_i32 = arith.constant 0 : i32
    %c0_i32_0 = arith.constant 0 : i32
    return %arg0, %c0_i32 : i32, i32
  }
}

</mosaic_0001>

<bundles_post_ra>
// kernel: tpu_custom_call.1
= control target key start
LH: loop header
LB: loop body
LE: loop exit
PB: predicated region body
PF: predicated region fallthrough
CT: control target
= control target key end

     0   :  { %v912_v2 = vmov 0   ;;  %s1433_s0 = inlined_call_operand.vmem [shape: f32[8,32,16], index: 0, kind: input, shape index: {}]   ;;  %s1434_s1 = inlined_call_operand.vmem [shape: f32[3,32,1], index: 1, kind: input, shape index: {}]   ;;  %s1435_s2 = inlined_call_operand.hbm [shape: f32[8,32], index: 2, kind: output, shape index: {}]  }
   0x1   :  { %v46_v0 = vld [vmem:[%s1434_s1 + $0x10] sm:$0xff]  ;;  %v44_v1 = vld [vmem:[%s1434_s1] sm:$0xff]  ;;  %791 = vset.pattern.permute.xlu1 %v912_v2  ;;  %790 = vset.pattern.permute.xlu0 %v912_v2  ;;  %v45_v4 = vld [vmem:[%s1434_s1 + $0x8] sm:$0xff] }
   0x2   :  { %68 = vperm.xlu1 %791, %v46_v0   ;;  %58 = vperm.xlu0 %790, %v44_v1   ;;  %v48_v3 = vld [vmem:[%s1434_s1 + $0x20] sm:$0xff]  ;;  %v47_v5 = vld [vmem:[%s1434_s1 + $0x18] sm:$0xff]  ;;  %v49_v6 = vld [vmem:[%s1434_s1 + $0x28] sm:$0xff] }
   0x6   :  { %110 = vperm.xlu1 %791, %v48_v3   ;;  %63 = vperm.xlu0 %790, %v45_v4  }
   0x7   :  { %7 = vsyncpa [#allocation3], 0  ;;  %v51_v7 = vld [vmem:[%s1434_s1 + $0x38] sm:$0xff]  ;;  %v50_v8 = vld [vmem:[%s1434_s1 + $0x30] sm:$0xff]  ;;  %vm244_vm0 = vcmask 130048   ;;  %vm608_vm1 = vcmask 130112  }
   0x8   :  { %v53_v9 = vld [vmem:[%s1434_s1 + $0x48] sm:$0xff]  ;;  %v52_v10 = vld [vmem:[%s1434_s1 + $0x40] sm:$0xff]  ;;  %v55_v11 = vld [vmem:[%s1434_s1 + $0x58] sm:$0xff]  ;;  %vm615_vm2 = vcmask 195712   ;;  %vm622_vm3 = vcmask 261312   ;;  %vm757_vm4 = vcmask 1041409  }
   0x9   :  { %v54_v12 = vld [vmem:[%s1434_s1 + $0x50] sm:$0xff]  ;;  %v970_v15 = vld [vmem:[%s1433_s0] sm:$0xff]  ;;  %v1017_v37 = vld [vmem:[%s1433_s0 + $0x8] sm:$0xff]  ;;  %vm759_vm5 = vcmask 1042434   ;;  %vm761_vm6 = vcmask 1043459   ;;  %vm763_vm7 = vcmask 1044484  }
   0xa   :  { %73 = vperm.xlu1 %791, %v47_v5   ;;  %115 = vperm.xlu0 %790, %v49_v6   ;;  %v975_v16 = vld [vmem:[%s1433_s0 + $0x20] sm:$0xff]  ;;  %v1022_v38 = vld [vmem:[%s1433_s0 + $0x28] sm:$0xff]  ;;  %v1053_v52 = vld [vmem:[%s1433_s0 + $0x10] sm:$0xff]  ;;  %vm765_vm8 = vcmask 1045509   ;;  %vm767_vm9 = vcmask 1046534   ;;  %vm769_vm10 = vcmask 1047559  }
   0xb   :  { %v980_v17 = vld [vmem:[%s1433_s0 + $0x40] sm:$0xff]  ;;  %v1028_v41 = vld [vmem:[%s1433_s0 + $0x48] sm:$0xff]  ;;  %v1064_v57 = vld [vmem:[%s1433_s0 + $0x30] sm:$0xff]  ;;  %vm772_vm11 = vcmask 261120  }
   0xc   :  { %v985_v18 = vld [vmem:[%s1433_s0 + $0x60] sm:$0xff]  ;;  %v1033_v43 = vld [vmem:[%s1433_s0 + $0x68] sm:$0xff]  ;;  %v1075_v61 = vld [vmem:[%s1433_s0 + $0x50] sm:$0xff] }
   0xd   :  { %v990_v19 = vld [vmem:[%s1433_s0 + $0x80] sm:$0xff]  ;;  %v1038_v46 = vld [vmem:[%s1433_s0 + $0x88] sm:$0xff]  ;;  %v1081_v63 = vld [vmem:[%s1433_s0 + $0x18] sm:$0xff] }
   0xe   :  { %125 = vperm.xlu1 %791, %v51_v7   ;;  %120 = vperm.xlu0 %790, %v50_v8   ;;  %v995_v20 = vld [vmem:[%s1433_s0 + $0xa0] sm:$0xff]  ;;  %v1047_v50 = vld [vmem:[%s1433_s0 + $0xa8] sm:$0xff]  ;;  %v1086_v1 = vld [vmem:[%s1433_s0 + $0x70] sm:$0xff] }
   0xf   :  { %v1003_v24 = vld [vmem:[%s1433_s0 + $0xc0] sm:$0xff]  ;;  %v1058_v53 = vld [vmem:[%s1433_s0 + $0xc8] sm:$0xff]  ;;  %v1096_v4 = vld [vmem:[%s1433_s0 + $0x38] sm:$0xff] }
  0x10   :  { %1445 = vst [vmem:[#allocation5_spill] sm:$0xff] %v1003_v24  ;;  %v1009_v28 = vld [vmem:[%s1433_s0 + $0xe0] sm:$0xff]  ;;  %1447 = vst [vmem:[#allocation7_spill] sm:$0xff] %v1058_v53  ;;  %v1069_v58 = vld [vmem:[%s1433_s0 + $0xe8] sm:$0xff] }
  0x11   :  { %1446 = vst [vmem:[#allocation6_spill] sm:$0xff] %v1009_v28  ;;  %1448 = vst [vmem:[#allocation8_spill] sm:$0xff] %v1069_v58  ;;  %v1101_v6 = vld [vmem:[%s1433_s0 + $0x90] sm:$0xff] }
  0x12   :  { %199 = vperm.xlu1 %791, %v53_v9   ;;  %194 = vperm.xlu0 %790, %v52_v10   ;;  %v1109_v9 = vld [vmem:[%s1433_s0 + $0x58] sm:$0xff] }
  0x16   :  { %209 = vperm.xlu1 %791, %v55_v11   ;;  %204 = vperm.xlu0 %790, %v54_v12  }
  0x81   :  { %v965_v13 = vpop.permute.xlu1 %68  ;;  %v59_v14 = vpop.permute.xlu0 %58 }
  0x82   :  { %v76_v21 = vmul.f32 %v59_v14, %v970_v15  ;;  %v80_v22 = vmul.f32 %v59_v14, %v975_v16  ;;  %v84_v23 = vmul.f32 %v59_v14, %v980_v17  ;;  %v88_v25 = vmul.f32 %v59_v14, %v985_v18 }
  0x83   :  { %v92_v29 = vmul.f32 %v59_v14, %v990_v19  ;;  %v96_v33 = vmul.f32 %v59_v14, %v995_v20  ;;  %v100_v35 = vmul.f32 %v59_v14, %v1003_v24  ;;  %v104_v39 = vmul.f32 %v59_v14, %v1009_v28 }
  0x84   :  { %v1090_v2 = vmul.f32 %v965_v13, %v1053_v52  ;;  %v82_v7 = vmul.f32 %v965_v13, %v1064_v57 }
  0x85   :  { %v111_v26 = vpop.permute.xlu1 %110  ;;  %v64_v27 = vpop.permute.xlu0 %63 }
  0x86   :  { %v128_v30 = vadd.f32 %v111_v26, %v76_v21  ;;  %v132_v31 = vadd.f32 %v111_v26, %v80_v22  ;;  %v136_v32 = vadd.f32 %v111_v26, %v84_v23  ;;  %v140_v34 = vadd.f32 %v111_v26, %v88_v25  ;;  %v1116_v21 = vld [vmem:[%s1433_s0 + $0xb0] sm:$0xff]  ;;  %v1123_v23 = vld [vmem:[%s1433_s0 + $0x78] sm:$0xff] }
  0x87   :  { %v144_v36 = vadd.f32 %v111_v26, %v92_v29  ;;  %v148_v40 = vadd.f32 %v111_v26, %v96_v33  ;;  %v152_v42 = vadd.f32 %v111_v26, %v100_v35  ;;  %v156_v45 = vadd.f32 %v111_v26, %v104_v39  ;;  %v1151_v39 = vld [vmem:[%s1433_s0 + $0xf8] sm:$0xff] }
  0x88   :  { %792 = vtanh.f32 %v128_v30  ;;  %v77_v47 = vmul.f32 %v64_v27, %v1017_v37  ;;  %v81_v48 = vmul.f32 %v64_v27, %v1022_v38  ;;  %v85_v51 = vmul.f32 %v64_v27, %v1028_v41  ;;  %v1132_v30 = vld [vmem:[%s1433_s0 + $0x98] sm:$0xff]  ;;  %1451 = vst [vmem:[#allocation11_spill] sm:$0xff] %v1151_v39 }
  0x89   :  { %794 = vtanh.f32 %v132_v31  ;;  %v116_v44 = vpop.permute.xlu0 %115  ;;  %v1042_v49 = vpop.permute.xlu1 %73  ;;  %v89_v54 = vmul.f32 %v64_v27, %v1033_v43  ;;  %v93_v59 = vmul.f32 %v64_v27, %v1038_v46  ;;  %v97_v62 = vmul.f32 %v64_v27, %v1047_v50  ;;  %v1137_v31 = vld [vmem:[%s1433_s0 + $0xb8] sm:$0xff] }
  0x8a   :  { %796 = vtanh.f32 %v136_v32  ;;  %v129_v55 = vadd.f32 %v116_v44, %v77_v47  ;;  %v133_v56 = vadd.f32 %v116_v44, %v81_v48  ;;  %v137_v60 = vadd.f32 %v116_v44, %v85_v51  ;;  %1449 = vst [vmem:[#allocation9_spill] sm:$0xff] %v1137_v31  ;;  %v1163_v47 = vld [vmem:[%s1433_s0 + $0xf0] sm:$0xff] }
  0x8b   :  { %798 = vtanh.f32 %v140_v34  ;;  %v141_v0 = vadd.f32 %v116_v44, %v89_v54  ;;  %v101_v3 = vmul.f32 %v64_v27, %v1058_v53  ;;  %v145_v5 = vadd.f32 %v116_v44, %v93_v59  ;;  %1453 = vst [vmem:[#allocation13_spill] sm:$0xff] %v1163_v47 }
  0x8c   :  { %800 = vtanh.f32 %v144_v36  ;;  %v105_v8 = vmul.f32 %v64_v27, %v1069_v58  ;;  %v149_v10 = vadd.f32 %v116_v44, %v97_v62  ;;  %v86_v22 = vmul.f32 %v965_v13, %v1075_v61  ;;  %v1146_v36 = vld [vmem:[%s1433_s0 + $0xd8] sm:$0xff] }
  0x8d   :  { %802 = vtanh.f32 %v148_v40  ;;  %v126_v11 = vpop.permute.xlu1 %125  ;;  %v1111_v12 = vpop.permute.xlu0 %120  ;;  %v79_v25 = vmul.f32 %v1042_v49, %v1081_v63  ;;  %v153_v26 = vadd.f32 %v116_v44, %v101_v3  ;;  %v90_v29 = vmul.f32 %v965_v13, %v1086_v1  ;;  %1450 = vst [vmem:[#allocation10_spill] sm:$0xff] %v1146_v36 }
  0x8e   :  { %804 = vtanh.f32 %v152_v42  ;;  %v83_v32 = vmul.f32 %v1042_v49, %v1096_v4  ;;  %v157_v33 = vadd.f32 %v116_v44, %v105_v8  ;;  %v94_v35 = vmul.f32 %v965_v13, %v1101_v6 }
  0x8f   :  { %806 = vtanh.f32 %v156_v45  ;;  %v87_v40 = vmul.f32 %v1042_v49, %v1109_v9  ;;  %v131_v42 = vadd.f32 %v126_v11, %v79_v25  ;;  %v1158_v45 = vld [vmem:[%s1433_s0 + $0xd0] sm:$0xff]  ;;  %v98_v48 = vmul.f32 %v965_v13, %v1116_v21  ;;  %s913_s0 = smov [#allocation2]  }
  0x90   :  { %808 = vtanh.f32 %v129_v55  ;;  %1452 = vst [vmem:[#allocation12_spill] sm:$0xff] %v1158_v45  ;;  %v91_v51 = vmul.f32 %v1042_v49, %v1123_v23  ;;  %v135_v54 = vadd.f32 %v126_v11, %v83_v32  ;;  %v99_v59 = vmul.f32 %v1042_v49, %v1137_v31  ;;  %s780_s1 = sshll.u32 %s913_s0, 4  ;;  %s781_s1 = int_to_ptr.vmem [resolvable:$true] %s780_s1 }
  0x91   :  { %810 = vtanh.f32 %v133_v56  ;;  %v95_v56 = vmul.f32 %v1042_v49, %v1132_v30  ;;  %v107_v3 = vmul.f32 %v1042_v49, %v1151_v39  ;;  %v195_v8 = vpop.permute.xlu0 %194  ;;  %v102_v25 = vmul.f32 %v965_v13, %v1158_v45  ;;  %s888_s11 = scalar_lea.vmem %s781_s1, 128  ;;  %p893_p1 = scmp.lt.s32.totalorder %s781_s1, %s781_s1 }
  0x92   :  { %v793_v14 = vpop.eup %792  ;;  %812 = vtanh.f32 %v137_v60  ;;  %v139_v60 = vadd.f32 %v126_v11, %v87_v40  ;;  %v106_v32 = vmul.f32 %v965_v13, %v1163_v47  ;;  %v151_v40 = vadd.f32 %v126_v11, %v99_v59  ;;  %p889_p0 = scmp.ne.s32.totalorder %s781_s1, %s888_s11  ;;  %p894_p2 = scmp.lt.s32.totalorder %s888_s11, %s888_s11 }
  0x93   :  { %v795_v27 = vpop.eup %794  ;;  %814 = vtanh.f32 %v141_v0  ;;  %v103_v0 = vmul.f32 %v1042_v49, %v1146_v36  ;;  %v147_v58 = vadd.f32 %v126_v11, %v95_v56  ;;  %v159_v31 = vadd.f32 %v126_v11, %v107_v3 }
  0x94   :  { %v797_v34 = vpop.eup %796  ;;  %816 = vtanh.f32 %v145_v5  ;;  %v143_v5 = vadd.f32 %v126_v11, %v91_v51  ;;  %v130_v49 = vadd.f32 %v1111_v12, %v1090_v2  ;;  %v216_v51 = vmul.f32 %v795_v27, %v195_v8  ;;  %p895_p3 = por %p894_p2, %p893_p1 }
  0x95   :  { %v799_v44 = vpop.eup %798  ;;  %818 = vtanh.f32 %v149_v10  ;;  %v155_v28 = vadd.f32 %v126_v11, %v103_v0  ;;  %v138_v45 = vadd.f32 %v1111_v12, %v86_v22  ;;  %v212_v13 = vmul.f32 %v793_v14, %v195_v8 }
  0x96   :  { %v801_v55 = vpop.eup %800  ;;  %820 = vtanh.f32 %v153_v26  ;;  %v220_v56 = vmul.f32 %v797_v34, %v195_v8  ;;  %v142_v59 = vadd.f32 %v1111_v12, %v90_v29  ;;  %v146_v11 = vadd.f32 %v1111_v12, %v94_v35  ;;  %p896_p4 = pnand %p895_p3, %p889_p0 }
  0x97   :  { %v803_v62 = vpop.eup %802  ;;  %822 = vtanh.f32 %v157_v33  ;;  %v134_v33 = vadd.f32 %v1111_v12, %v82_v7  ;;  %v150_v2 = vadd.f32 %v1111_v12, %v98_v48  ;;  %v154_v7 = vadd.f32 %v1111_v12, %v102_v25 }
  0x98   :  { %v805_v10 = vpop.eup %804  ;;  %824 = vtanh.f32 %v131_v42  ;;  %v158_v14 = vadd.f32 %v1111_v12, %v106_v32  ;;  %v245_v29 = vsel %vm244_vm0, %v212_v13, 0.0  ;;  %v228_v35 = vmul.f32 %v801_v55, %v195_v8 }
  0x99   :  { %v807_v26 = vpop.eup %806  ;;  %826 = vtanh.f32 %v135_v54  ;;  %v200_v54 = vpop.permute.xlu1 %199  ;;  %v236_v48 = vmul.f32 %v805_v10, %v195_v8 }
  0x9a   :  { %v809_v36 = vpop.eup %808  ;;  %828 = vtanh.f32 %v139_v60  ;;  %v224_v60 = vmul.f32 %v799_v44, %v195_v8  ;;  %v271_v44 = vsel %vm244_vm0, %v220_v56, 0.0 }
  0x9b   :  { %v811_v39 = vpop.eup %810  ;;  %830 = vtanh.f32 %v143_v5  ;;  %v213_v27 = vmul.f32 %v809_v36, %v200_v54  ;;  %v232_v36 = vmul.f32 %v803_v62, %v195_v8  ;;  %v323_v62 = vsel %vm244_vm0, %v236_v48, 0.0 }
  0x9c   :  { %v813_v42 = vpop.eup %812  ;;  %832 = vtanh.f32 %v147_v58  ;;  %v217_v22 = vmul.f32 %v811_v39, %v200_v54  ;;  %v258_v58 = vsel %vm244_vm0, %v216_v51, 0.0  ;;  %v284_v25 = vsel %vm244_vm0, %v224_v60, 0.0 }
  0x9d   :  { %v815_v0 = vpop.eup %814  ;;  %834 = vtanh.f32 %v151_v40  ;;  %v221_v12 = vmul.f32 %v813_v42, %v200_v54  ;;  %v240_v39 = vmul.f32 %v807_v26, %v195_v8 }
  0x9e   :  { %v817_v3 = vpop.eup %816  ;;  %836 = vtanh.f32 %v155_v28  ;;  %v246_v28 = vsel %vm244_vm0, %v213_v27, 0.0  ;;  %v225_v55 = vmul.f32 %v815_v0, %v200_v54 }
  0x9f   :  { %v819_v34 = vpop.eup %818  ;;  %838 = vtanh.f32 %v159_v31  ;;  %v259_v31 = vsel %vm244_vm0, %v217_v22, 0.0  ;;  %v229_v51 = vmul.f32 %v817_v3, %v200_v54  ;;  %v247_v26 = vadd.f32 %v246_v28, %v245_v29 }
  0xa0   :  { %v821_v5 = vpop.eup %820  ;;  %840 = vtanh.f32 %v130_v49  ;;  %v297_v49 = vsel %vm244_vm0, %v228_v35, 0.0  ;;  %v233_v56 = vmul.f32 %v819_v34, %v200_v54  ;;  %v336_v27 = vsel %vm244_vm0, %v240_v39, 0.0 }
  0xa1   :  { %v823_v40 = vpop.eup %822  ;;  %842 = vtanh.f32 %v134_v33  ;;  %v237_v10 = vmul.f32 %v821_v5, %v200_v54  ;;  %v310_v33 = vsel %vm244_vm0, %v232_v36, 0.0  ;;  %v298_v3 = vsel %vm244_vm0, %v229_v51, 0.0  ;;  %v205_v51 = vpop.permute.xlu0 %204 }
  0xa2   :  { %v825_v32 = vpop.eup %824  ;;  %844 = vtanh.f32 %v138_v45  ;;  %v241_v42 = vmul.f32 %v823_v40, %v200_v54  ;;  %v260_v45 = vadd.f32 %v259_v31, %v258_v58  ;;  %v272_v22 = vsel %vm244_vm0, %v221_v12, 0.0 }
  0xa3   :  { %v827_v13 = vpop.eup %826  ;;  %846 = vtanh.f32 %v142_v59  ;;  %v210_v59 = vpop.permute.xlu1 %209  ;;  %v324_v54 = vsel %vm244_vm0, %v237_v10, 0.0  ;;  %v273_v28 = vadd.f32 %v272_v22, %v271_v44 }
  0xa4   :  { %v829_v60 = vpop.eup %828  ;;  %848 = vtanh.f32 %v146_v11  ;;  %v285_v11 = vsel %vm244_vm0, %v225_v55, 0.0  ;;  %v219_v35 = vmul.f32 %v827_v13, %v210_v59  ;;  %v215_v5 = vmul.f32 %v825_v32, %v210_v59 }
  0xa5   :  { %v831_v8 = vpop.eup %830  ;;  %850 = vtanh.f32 %v150_v2  ;;  %v311_v2 = vsel %vm244_vm0, %v233_v56, 0.0  ;;  %v223_v29 = vmul.f32 %v829_v60, %v210_v59  ;;  %v286_v39 = vadd.f32 %v285_v11, %v284_v25 }
  0xa6   :  { %v833_v0 = vpop.eup %832  ;;  %852 = vtanh.f32 %v154_v7  ;;  %v227_v48 = vmul.f32 %v831_v8, %v210_v59  ;;  %v337_v7 = vsel %vm244_vm0, %v241_v42, 0.0  ;;  %v299_v55 = vadd.f32 %v298_v3, %v297_v49 }
  0xa7   :  { %v835_v34 = vpop.eup %834  ;;  %854 = vtanh.f32 %v158_v14  ;;  %v231_v40 = vmul.f32 %v833_v0, %v210_v59  ;;  %v325_v32 = vadd.f32 %v324_v54, %v323_v62  ;;  %v312_v47 = vadd.f32 %v311_v2, %v310_v33 }
  0xa8   :  { %v837_v58 = vpop.eup %836  ;;  %v235_v12 = vmul.f32 %v835_v34, %v210_v59  ;;  %v250_v56 = vsel %vm244_vm0, %v215_v5, 0.0  ;;  %v338_v60 = vadd.f32 %v337_v7, %v336_v27  ;;  %v263_v42 = vsel %vm244_vm0, %v219_v35, 0.0 }
  0xa9   :  { %v839_v36 = vpop.eup %838  ;;  %v239_v13 = vmul.f32 %v837_v58, %v210_v59  ;;  %v276_v44 = vsel %vm244_vm0, %v223_v29, 0.0  ;;  %v289_v25 = vsel %vm244_vm0, %v227_v48, 0.0  ;;  %v302_v62 = vsel %vm244_vm0, %v231_v40, 0.0 }
  0xaa   :  { %v841_v31 = vpop.eup %840  ;;  %v243_v14 = vmul.f32 %v839_v36, %v210_v59  ;;  %v315_v3 = vsel %vm244_vm0, %v235_v12, 0.0 }
  0xab   :  { %v843_v10 = vpop.eup %842  ;;  %v214_v53 = vmul.f32 %v841_v31, %v205_v51  ;;  %v328_v11 = vsel %vm244_vm0, %v239_v13, 0.0 }
  0xac   :  { %v845_v8 = vpop.eup %844  ;;  %v218_v24 = vmul.f32 %v843_v10, %v205_v51  ;;  %v341_v58 = vsel %vm244_vm0, %v243_v14, 0.0 }
  0xad   :  { %v847_v0 = vpop.eup %846  ;;  %v248_v49 = vsel %vm244_vm0, %v214_v53, 0.0  ;;  %v222_v33 = vmul.f32 %v845_v8, %v205_v51 }
  0xae   :  { %v849_v22 = vpop.eup %848  ;;  %v261_v59 = vsel %vm244_vm0, %v218_v24, 0.0  ;;  %v249_v27 = vadd.f32 %v248_v49, %v247_v26  ;;  %v226_v34 = vmul.f32 %v847_v0, %v205_v51 }
  0xaf   :  { %v851_v35 = vpop.eup %850  ;;  %v262_v5 = vadd.f32 %v261_v59, %v260_v45  ;;  %v230_v54 = vmul.f32 %v849_v22, %v205_v51  ;;  %v274_v2 = vsel %vm244_vm0, %v222_v33, 0.0 }
  0xb0   :  { %v853_v53 = vpop.eup %852  ;;  %v251_v29 = vadd.f32 %v250_v56, %v249_v27  ;;  %v275_v48 = vadd.f32 %v274_v2, %v273_v28  ;;  %v287_v7 = vsel %vm244_vm0, %v226_v34, 0.0  ;;  %v234_v36 = vmul.f32 %v851_v35, %v205_v51 }
  0xb1   :  { %v264_v40 = vadd.f32 %v263_v42, %v262_v5  ;;  %v300_v24 = vsel %vm244_vm0, %v230_v54, 0.0  ;;  %v238_v26 = vmul.f32 %v853_v53, %v205_v51  ;;  %v288_v12 = vadd.f32 %v287_v7, %v286_v39  ;;  %v855_v31 = vpop.eup %854 }
  0xb2   :  { %v252_v13 = vrot.slane %v251_v29, 4  ;;  %v301_v10 = vadd.f32 %v300_v24, %v299_v55  ;;  %v277_v45 = vadd.f32 %v276_v44, %v275_v48  ;;  %v313_v8 = vsel %vm244_vm0, %v234_v36, 0.0 }
  0xb3   :  { %v265_v0 = vrot.slane %v264_v40, 4  ;;  %v326_v14 = vsel %vm244_vm0, %v238_v26, 0.0  ;;  %v290_v49 = vadd.f32 %v289_v25, %v288_v12  ;;  %v314_v56 = vadd.f32 %v313_v8, %v312_v47 }
  0xb4   :  { %v253_v28 = vadd.f32 %v252_v13, %v251_v29  ;;  %v303_v33 = vadd.f32 %v302_v62, %v301_v10  ;;  %v278_v22 = vrot.slane %v277_v45, 4  ;;  %v327_v59 = vadd.f32 %v326_v14, %v325_v32 }
  0xb5   :  { %v266_v42 = vadd.f32 %v265_v0, %v264_v40  ;;  %v291_v27 = vrot.slane %v290_v49, 4  ;;  %v316_v34 = vadd.f32 %v315_v3, %v314_v56  ;;  %v242_v35 = vmul.f32 %v855_v31, %v205_v51 }
  0xb6   :  { %v254_v39 = vrot.slane %v253_v28, 2  ;;  %v304_v5 = vrot.slane %v303_v33, 4  ;;  %v279_v54 = vadd.f32 %v278_v22, %v277_v45  ;;  %v329_v55 = vadd.f32 %v328_v11, %v327_v59 }
  0xb7   :  { %v267_v44 = vrot.slane %v266_v42, 2  ;;  %v292_v2 = vadd.f32 %v291_v27, %v290_v49  ;;  %v317_v53 = vrot.slane %v316_v34, 4  ;;  %v339_v48 = vsel %vm244_vm0, %v242_v35, 0.0 }
  0xb8   :  { %v255_v7 = vadd.f32 %v254_v39, %v253_v28  ;;  %v305_v25 = vadd.f32 %v304_v5, %v303_v33  ;;  %v280_v47 = vrot.slane %v279_v54, 2  ;;  %v330_v29 = vrot.slane %v329_v55, 4 }
  0xb9   :  { %v268_v62 = vadd.f32 %v267_v44, %v266_v42  ;;  %v293_v36 = vrot.slane %v292_v2, 2  ;;  %v318_v32 = vadd.f32 %v317_v53, %v316_v34  ;;  %v340_v40 = vadd.f32 %v339_v48, %v338_v60 }
  0xba   :  { %v256_v24 = vrot.slane %v255_v7, 1  ;;  %v306_v3 = vrot.slane %v305_v25, 2  ;;  %v281_v51 = vadd.f32 %v280_v47, %v279_v54  ;;  %v331_v26 = vadd.f32 %v330_v29, %v329_v55 }
  0xbb   :  { %v269_v12 = vrot.slane %v268_v62, 1  ;;  %v294_v31 = vadd.f32 %v293_v36, %v292_v2  ;;  %v319_v11 = vrot.slane %v318_v32, 2  ;;  %v342_v13 = vadd.f32 %v341_v58, %v340_v40 }
  0xbc   :  { %v257_v10 = vadd.f32 %v256_v24, %v255_v7  ;;  %v307_v45 = vadd.f32 %v306_v3, %v305_v25  ;;  %v282_v8 = vrot.slane %v281_v51, 1  ;;  %v332_v0 = vrot.slane %v331_v26, 2 }
  0xbd   :  { %v270_v14 = vadd.f32 %v269_v12, %v268_v62  ;;  %v295_v49 = vrot.slane %v294_v31, 1  ;;  %v320_v56 = vadd.f32 %v319_v11, %v318_v32  ;;  %v343_v28 = vrot.slane %v342_v13, 4 }
  0xbe   :  { %v349_v33 = vsel %vm244_vm0, %v257_v10, -inf  ;;  %v308_v22 = vrot.slane %v307_v45, 1  ;;  %v283_v60 = vadd.f32 %v282_v8, %v281_v51  ;;  %v333_v59 = vadd.f32 %v332_v0, %v331_v26 }
  0xbf   :  { %v352_v42 = vsel %vm244_vm0, %v270_v14, -inf  ;;  %350 = vmax.xlane.f32.xlu0 %v349_v33  ;;  %v344_v27 = vadd.f32 %v343_v28, %v342_v13  ;;  %v296_v5 = vadd.f32 %v295_v49, %v294_v31  ;;  %v321_v54 = vrot.slane %v320_v56, 1 }
  0xc0   :  { %353 = vmax.xlane.f32.xlu1 %v352_v42  ;;  %v309_v34 = vadd.f32 %v308_v22, %v307_v45  ;;  %v334_v58 = vrot.slane %v333_v59, 1  ;;  %v355_v39 = vsel %vm244_vm0, %v283_v60, -inf }
  0xc1   :  { %v345_v35 = vrot.slane %v344_v27, 2  ;;  %v358_v53 = vsel %vm244_vm0, %v296_v5, -inf  ;;  %v322_v48 = vadd.f32 %v321_v54, %v320_v56 }
  0xc2   :  { %v361_v55 = vsel %vm244_vm0, %v309_v34, -inf  ;;  %v335_v44 = vadd.f32 %v334_v58, %v333_v59 }
  0xc3   :  { %356 = vmax.xlane.f32.xlu0 %v355_v39  ;;  %v346_v2 = vadd.f32 %v345_v35, %v344_v27  ;;  %v364_v47 = vsel %vm244_vm0, %v322_v48, -inf }
  0xc4   :  { %362 = vmax.xlane.f32.xlu1 %v361_v55  ;;  %v367_v25 = vsel %vm244_vm0, %v335_v44, -inf }
  0xc5   :  { %v347_v7 = vrot.slane %v346_v2, 1 }
  0xc7   :  { %359 = vmax.xlane.f32.xlu0 %v358_v53  ;;  %v348_v29 = vadd.f32 %v347_v7, %v346_v2 }
  0xc8   :  { %368 = vmax.xlane.f32.xlu1 %v367_v25 }
  0xc9   :  { %v370_v62 = vsel %vm244_vm0, %v348_v29, -inf }
  0xcb   :  { %365 = vmax.xlane.f32.xlu0 %v364_v47 }
  0xcf   :  { %371 = vmax.xlane.f32.xlu0 %v370_v62 }
 0x14c   :  { %v351_v36 = vpop.xlane.xlu0 %350 }
 0x14d   :  { %v354_v32 = vpop.xlane.xlu1 %353  ;;  %v373_v40 = vsub.f32 %v257_v10, %v351_v36 }
 0x14e   :  { %v374_v24 = vsub.f32 %v270_v14, %v354_v32 }
 0x14f   :  { %v381_v3 = vmul.f32 1.442695, %v373_v40 }
 0x150   :  { %v383_v51 = vmul.f32 1.442695, %v374_v24  ;;  %v357_v26 = vpop.xlane.xlu0 %356 }
 0x151   :  { %856 = vpow2.f32 %v381_v3  ;;  %v363_v12 = vpop.xlane.xlu1 %362  ;;  %v375_v31 = vsub.f32 %v283_v60, %v357_v26 }
 0x152   :  { %858 = vpow2.f32 %v383_v51  ;;  %v377_v11 = vsub.f32 %v309_v34, %v363_v12 }
 0x153   :  { %v385_v13 = vmul.f32 1.442695, %v375_v31 }
 0x154   :  { %v389_v45 = vmul.f32 1.442695, %v377_v11  ;;  %v360_v8 = vpop.xlane.xlu0 %359 }
 0x155   :  { %860 = vpow2.f32 %v385_v13  ;;  %v369_v0 = vpop.xlane.xlu1 %368  ;;  %v376_v49 = vsub.f32 %v296_v5, %v360_v8 }
 0x156   :  { %v379_v56 = vsub.f32 %v335_v44, %v369_v0  ;;  %862 = vpow2.f32 %v389_v45 }
 0x157   :  { %v387_v28 = vmul.f32 1.442695, %v376_v49 }
 0x158   :  { %v393_v33 = vmul.f32 1.442695, %v379_v56  ;;  %v366_v10 = vpop.xlane.xlu0 %365 }
 0x159   :  { %864 = vpow2.f32 %v387_v28  ;;  %v378_v14 = vsub.f32 %v322_v48, %v366_v10 }
 0x15a   :  { %866 = vpow2.f32 %v393_v33 }
 0x15b   :  { %v857_v22 = vpop.eup %856  ;;  %v391_v59 = vmul.f32 1.442695, %v378_v14 }
 0x15c   :  { %v859_v42 = vpop.eup %858  ;;  %v372_v60 = vpop.xlane.xlu0 %371  ;;  %v397_v27 = vsel %vm244_vm0, %v857_v22, 0.0 }
 0x15d   :  { %868 = vpow2.f32 %v391_v59  ;;  %v380_v34 = vsub.f32 %v348_v29, %v372_v60  ;;  %v400_v58 = vsel %vm244_vm0, %v859_v42, 0.0  ;;  %398 = vadd.xlane.f32.xlu1 %v397_v27 }
 0x15e   :  { %401 = vadd.xlane.f32.xlu0 %v400_v58 }
 0x15f   :  { %v861_v35 = vpop.eup %860  ;;  %v395_v39 = vmul.f32 1.442695, %v380_v34 }
 0x160   :  { %v403_v5 = vsel %vm244_vm0, %v861_v35, 0.0  ;;  %v1233_v54 = vpop.eup %862 }
 0x161   :  { %870 = vpow2.f32 %v395_v39  ;;  %404 = vadd.xlane.f32.xlu1 %v403_v5  ;;  %v409_v44 = vsel %vm244_vm0, %v1233_v54, 0.0 }
 0x163   :  { %v865_v55 = vpop.eup %864 }
 0x164   :  { %v406_v2 = vsel %vm244_vm0, %v865_v55, 0.0  ;;  %v1238_v53 = vpop.eup %866 }
 0x165   :  { %410 = vadd.xlane.f32.xlu1 %v409_v44  ;;  %407 = vadd.xlane.f32.xlu0 %v406_v2  ;;  %v415_v7 = vsel %vm244_vm0, %v1238_v53, 0.0 }
 0x167   :  { %v1240_v48 = vpop.eup %868 }
 0x168   :  { %v412_v25 = vsel %vm244_vm0, %v1240_v48, 0.0 }
 0x169   :  { %416 = vadd.xlane.f32.xlu1 %v415_v7  ;;  %413 = vadd.xlane.f32.xlu0 %v412_v25 }
 0x16b   :  { %v1246_v47 = vpop.eup %870 }
 0x16c   :  { %v418_v29 = vsel %vm244_vm0, %v1246_v47, 0.0 }
 0x16d   :  { %419 = vadd.xlane.f32.xlu0 %v418_v29 }
 0x1ea   :  { %v399_v62 = vpop.xlane.xlu1 %398 }
 0x1eb   :  { %872 = vrcp.f32 %v399_v62  ;;  %v402_v36 = vpop.xlane.xlu0 %401 }
 0x1ec   :  { %874 = vrcp.f32 %v402_v36 }
 0x1ee   :  { %v405_v32 = vpop.xlane.xlu1 %404 }
 0x1ef   :  { %876 = vrcp.f32 %v405_v32 }
 0x1f2   :  { %v408_v3 = vpop.xlane.xlu0 %407  ;;  %v411_v56 = vpop.xlane.xlu1 %410 }
 0x1f3   :  { %878 = vrcp.f32 %v408_v3 }
 0x1f4   :  { %880 = vrcp.f32 %v411_v56  ;;  %v1457_v56 = vld [vmem:[#allocation12_spill] sm:$0xff] }
 0x1f5   :  { %v873_v40 = vpop.eup %872 }
 0x1f6   :  { %v875_v24 = vpop.eup %874  ;;  %v429_v51 = vmul.f32 %v873_v40, %v857_v22  ;;  %v414_v59 = vpop.xlane.xlu0 %413 }
 0x1f7   :  { %v430_v26 = vmul.f32 %v875_v24, %v859_v42  ;;  %882 = vrcp.f32 %v414_v59  ;;  %v417_v39 = vpop.xlane.xlu1 %416  ;;  %v1461_v59 = vld [vmem:[#allocation13_spill] sm:$0xff] }
 0x1f8   :  { %v437_v12 = vmul.f32 %v429_v51, %v970_v15  ;;  %v438_v31 = vmul.f32 %v429_v51, %v1017_v37  ;;  %v439_v49 = vmul.f32 %v429_v51, %v1053_v52  ;;  %v440_v60 = vmul.f32 %v429_v51, %v1081_v63 }
 0x1f9   :  { %v442_v45 = vmul.f32 %v430_v26, %v1022_v38  ;;  %v441_v8 = vmul.f32 %v430_v26, %v975_v16  ;;  %v877_v0 = vpop.eup %876  ;;  %v443_v37 = vmul.f32 %v430_v26, %v1064_v57  ;;  %v444_v22 = vmul.f32 %v430_v26, %v1096_v4 }
 0x1fa   :  { %v469_v11 = vsel %vm244_vm0, %v437_v12, 0.0  ;;  %v472_v13 = vsel %vm244_vm0, %v438_v31, 0.0  ;;  %v431_v33 = vmul.f32 %v877_v0, %v861_v35  ;;  %v475_v16 = vsel %vm244_vm0, %v439_v49, 0.0  ;;  %v420_v29 = vpop.xlane.xlu0 %419  ;;  %v1454_v12 = vld [vmem:[#allocation5_spill] sm:$0xff] }
 0x1fb   :  { %470 = vadd.xlane.f32.xlu1 %v469_v11  ;;  %473 = vadd.xlane.f32.xlu0 %v472_v13  ;;  %v484_v28 = vsel %vm244_vm0, %v442_v45, 0.0  ;;  %v481_v15 = vsel %vm244_vm0, %v441_v8, 0.0  ;;  %v487_v38 = vsel %vm244_vm0, %v443_v37, 0.0  ;;  %884 = vrcp.f32 %v417_v39 }
 0x1fc   :  { %v446_v10 = vmul.f32 %v431_v33, %v1028_v41  ;;  %v445_v14 = vmul.f32 %v431_v33, %v980_v17  ;;  %v490_v41 = vsel %vm244_vm0, %v444_v22, 0.0  ;;  %v478_v17 = vsel %vm244_vm0, %v440_v60, 0.0 }
 0x1fd   :  { %v879_v52 = vpop.eup %878  ;;  %v447_v34 = vmul.f32 %v431_v33, %v1075_v61  ;;  %v448_v35 = vmul.f32 %v431_v33, %v1109_v9  ;;  %886 = vrcp.f32 %v420_v29  ;;  %v597_v29 = vlaneseq }
 0x1fe   :  { %v496_v57 = vsel %vm244_vm0, %v446_v10, 0.0  ;;  %v493_v42 = vsel %vm244_vm0, %v445_v14, 0.0  ;;  %v432_v27 = vmul.f32 %v879_v52, %v865_v55  ;;  %v881_v4 = vpop.eup %880  ;;  %v1460_v14 = vld [vmem:[#allocation10_spill] sm:$0xff] }
 0x1ff   :  { %485 = vadd.xlane.f32.xlu0 %v484_v28  ;;  %482 = vadd.xlane.f32.xlu1 %v481_v15  ;;  %v499_v63 = vsel %vm244_vm0, %v447_v34, 0.0  ;;  %v433_v44 = vmul.f32 %v881_v4, %v1233_v54  ;;  %v1458_v15 = vld [vmem:[#allocation6_spill] sm:$0xff] }
 0x200   :  { %v449_v58 = vmul.f32 %v432_v27, %v985_v18  ;;  %v450_v55 = vmul.f32 %v432_v27, %v1033_v43  ;;  %v502_v18 = vsel %vm244_vm0, %v448_v35, 0.0  ;;  %v451_v2 = vmul.f32 %v432_v27, %v1086_v1 }
 0x201   :  { %v453_v9 = vmul.f32 %v433_v44, %v990_v19  ;;  %v883_v7 = vpop.eup %882  ;;  %v454_v25 = vmul.f32 %v433_v44, %v1038_v46  ;;  %v452_v62 = vmul.f32 %v432_v27, %v1123_v23  ;;  %v455_v32 = vmul.f32 %v433_v44, %v1101_v6 }
 0x202   :  { %v505_v5 = vsel %vm244_vm0, %v449_v58, 0.0  ;;  %v508_v61 = vsel %vm244_vm0, %v450_v55, 0.0  ;;  %v511_v43 = vsel %vm244_vm0, %v451_v2, 0.0  ;;  %v434_v36 = vmul.f32 %v883_v7, %v1240_v48 }
 0x203   :  { %488 = vadd.xlane.f32.xlu0 %v487_v38  ;;  %476 = vadd.xlane.f32.xlu1 %v475_v16  ;;  %v517_v54 = vsel %vm244_vm0, %v453_v9, 0.0  ;;  %v520_v1 = vsel %vm244_vm0, %v454_v25, 0.0  ;;  %v514_v19 = vsel %vm244_vm0, %v452_v62, 0.0  ;;  %v456_v24 = vmul.f32 %v433_v44, %v1132_v30  ;;  %v1455_v30 = vld [vmem:[#allocation7_spill] sm:$0xff]  ;;  %v1459_v16 = vld [vmem:[#allocation8_spill] sm:$0xff] }
 0x204   :  { %v457_v46 = vmul.f32 %v434_v36, %v995_v20  ;;  %v523_v23 = vsel %vm244_vm0, %v455_v32, 0.0  ;;  %v458_v3 = vmul.f32 %v434_v36, %v1047_v50  ;;  %v459_v20 = vmul.f32 %v434_v36, %v1116_v21 }
 0x205   :  { %v885_v40 = vpop.eup %884  ;;  %v526_v6 = vsel %vm244_vm0, %v456_v24, 0.0  ;;  %v598_v62 = vand.u32 127, %v597_v29 }
 0x206   :  { %v529_v48 = vsel %vm244_vm0, %v457_v46, 0.0  ;;  %v435_v51 = vmul.f32 %v885_v40, %v1238_v53  ;;  %v532_v26 = vsel %vm244_vm0, %v458_v3, 0.0  ;;  %v535_v45 = vsel %vm244_vm0, %v459_v20, 0.0  ;;  %v1456_v53 = vld [vmem:[#allocation9_spill] sm:$0xff] }
 0x207   :  { %497 = vadd.xlane.f32.xlu0 %v496_v57  ;;  %494 = vadd.xlane.f32.xlu1 %v493_v42  ;;  %v887_v11 = vpop.eup %886  ;;  %v460_v8 = vmul.f32 %v434_v36, %v1456_v53  ;;  %v1462_v42 = vld [vmem:[#allocation11_spill] sm:$0xff]  ;;  %v603_v32 = vadd.s32 4294967288, %v598_v62  ;;  %v610_v46 = vadd.s32 4294967280, %v598_v62  ;;  %v617_v40 = vadd.s32 4294967272, %v598_v62 }
 0x208   :  { %v461_v31 = vmul.f32 %v435_v51, %v1454_v12  ;;  %v462_v13 = vmul.f32 %v435_v51, %v1455_v30  ;;  %v436_v0 = vmul.f32 %v887_v11, %v1246_v47  ;;  %v463_v28 = vmul.f32 %v435_v51, %v1457_v56 }
 0x209   :  { %v538_v21 = vsel %vm244_vm0, %v460_v8, 0.0  ;;  %v464_v47 = vmul.f32 %v435_v51, %v1460_v14 }
 0x20a   :  { %v541_v50 = vsel %vm244_vm0, %v461_v31, 0.0  ;;  %v544_v49 = vsel %vm244_vm0, %v462_v13, 0.0  ;;  %v465_v37 = vmul.f32 %v436_v0, %v1458_v15  ;;  %v547_v33 = vsel %vm244_vm0, %v463_v28, 0.0 }
 0x20b   :  { %491 = vadd.xlane.f32.xlu0 %v490_v41  ;;  %479 = vadd.xlane.f32.xlu1 %v478_v17  ;;  %v466_v10 = vmul.f32 %v436_v0, %v1459_v16  ;;  %v550_v22 = vsel %vm244_vm0, %v464_v47, 0.0  ;;  %v467_v57 = vmul.f32 %v436_v0, %v1461_v59  ;;  %v468_v60 = vmul.f32 %v436_v0, %v1462_v42 }
 0x20c   :  { %v553_v38 = vsel %vm244_vm0, %v465_v37, 0.0 }
 0x20d   :  { %v556_v52 = vsel %vm244_vm0, %v466_v10, 0.0  ;;  %v559_v27 = vsel %vm244_vm0, %v467_v57, 0.0  ;;  %v562_v41 = vsel %vm244_vm0, %v468_v60, 0.0 }
 0x20f   :  { %500 = vadd.xlane.f32.xlu1 %v499_v63  ;;  %506 = vadd.xlane.f32.xlu0 %v505_v5 }
 0x213   :  { %509 = vadd.xlane.f32.xlu1 %v508_v61  ;;  %503 = vadd.xlane.f32.xlu0 %v502_v18 }
 0x217   :  { %512 = vadd.xlane.f32.xlu1 %v511_v43  ;;  %518 = vadd.xlane.f32.xlu0 %v517_v54 }
 0x21b   :  { %521 = vadd.xlane.f32.xlu1 %v520_v1  ;;  %515 = vadd.xlane.f32.xlu0 %v514_v19  ;;  %v600_v19 = vshrl.u32 %v597_v29, 7 }
 0x21d   :  { %v1338_v3 = vsub.s32 %v603_v32, %v600_v19  ;;  %v1340_v51 = vsub.s32 %v610_v46, %v600_v19 }
 0x21f   :  { %524 = vadd.xlane.f32.xlu1 %v523_v23  ;;  %530 = vadd.xlane.f32.xlu0 %v529_v48  ;;  %v1336_v48 = vsub.s32 %v598_v62, %v600_v19 }
 0x223   :  { %533 = vadd.xlane.f32.xlu1 %v532_v26  ;;  %527 = vadd.xlane.f32.xlu0 %v526_v6  ;;  %v1342_v26 = vsub.s32 %v617_v40, %v600_v19 }
 0x227   :  { %536 = vadd.xlane.f32.xlu1 %v535_v45  ;;  %542 = vadd.xlane.f32.xlu0 %v541_v50 }
 0x22b   :  { %545 = vadd.xlane.f32.xlu1 %v544_v49  ;;  %539 = vadd.xlane.f32.xlu0 %v538_v21 }
 0x22f   :  { %548 = vadd.xlane.f32.xlu1 %v547_v33  ;;  %554 = vadd.xlane.f32.xlu0 %v553_v38 }
 0x233   :  { %557 = vadd.xlane.f32.xlu1 %v556_v52  ;;  %551 = vadd.xlane.f32.xlu0 %v550_v22 }
 0x237   :  { %560 = vadd.xlane.f32.xlu1 %v559_v27  ;;  %563 = vadd.xlane.f32.xlu0 %v562_v41 }
 0x288   :  { %v471_v17 = vpop.xlane.xlu1 %470  ;;  %v474_v34 = vpop.xlane.xlu0 %473 }
 0x289   :  { %v602_v12 = vrot.slane %v471_v17, %v1336_v48  ;;  %v607_v31 = vrot.slane %v474_v34, %v1338_v3 }
 0x28b   :  { %v609_v28 = vsel %vm608_vm1, %v607_v31, %v602_v12 }
 0x28c   :  { %v483_v58 = vpop.xlane.xlu1 %482  ;;  %v486_v4 = vpop.xlane.xlu0 %485 }
 0x28d   :  { %v627_v11 = vrot.slane %v483_v58, %v1336_v48  ;;  %v631_v30 = vrot.slane %v486_v4, %v1338_v3 }
 0x28f   :  { %v632_v15 = vsel %vm608_vm1, %v631_v30, %v627_v11 }
 0x290   :  { %v477_v35 = vpop.xlane.xlu1 %476  ;;  %v489_v39 = vpop.xlane.xlu0 %488 }
 0x291   :  { %v614_v13 = vrot.slane %v477_v35, %v1340_v51  ;;  %v636_v45 = vrot.slane %v489_v39, %v1340_v51 }
 0x293   :  { %v616_v33 = vsel %vm615_vm2, %v614_v13, %v609_v28  ;;  %v637_v38 = vsel %vm615_vm2, %v636_v45, %v632_v15 }
 0x294   :  { %v495_v63 = vpop.xlane.xlu1 %494  ;;  %v498_v5 = vpop.xlane.xlu0 %497 }
 0x295   :  { %v646_v50 = vrot.slane %v495_v63, %v1336_v48  ;;  %v650_v53 = vrot.slane %v498_v5, %v1338_v3 }
 0x297   :  { %v651_v16 = vsel %vm608_vm1, %v650_v53, %v646_v50 }
 0x298   :  { %v480_v55 = vpop.xlane.xlu1 %479  ;;  %v492_v44 = vpop.xlane.xlu0 %491 }
 0x299   :  { %v621_v8 = vrot.slane %v480_v55, %v1342_v26  ;;  %v641_v21 = vrot.slane %v492_v44, %v1342_v26 }
 0x29b   :  { %v623_v10 = vsel %vm622_vm3, %v621_v8, %v616_v33  ;;  %v642_v59 = vsel %vm622_vm3, %v641_v21, %v637_v38 }
 0x29c   :  { %v501_v61 = vpop.xlane.xlu1 %500  ;;  %v507_v18 = vpop.xlane.xlu0 %506 }
 0x29d   :  { %v655_v56 = vrot.slane %v501_v61, %v1340_v51  ;;  %v665_v14 = vrot.slane %v507_v18, %v1336_v48 }
 0x29f   :  { %v656_v57 = vsel %vm615_vm2, %v655_v56, %v651_v16 }
 0x2a0   :  { %v510_v2 = vpop.xlane.xlu1 %509  ;;  %v1318_v9 = vpop.xlane.xlu0 %503 }
 0x2a1   :  { %v669_v37 = vrot.slane %v510_v2, %v1338_v3  ;;  %v660_v47 = vrot.slane %v1318_v9, %v1342_v26 }
 0x2a3   :  { %v670_v27 = vsel %vm608_vm1, %v669_v37, %v665_v14  ;;  %v661_v63 = vsel %vm622_vm3, %v660_v47, %v656_v57 }
 0x2a4   :  { %v1320_v7 = vpop.xlane.xlu1 %512  ;;  %v1322_v25 = vpop.xlane.xlu0 %518 }
 0x2a5   :  { %v674_v42 = vrot.slane %v1320_v7, %v1340_v51  ;;  %v684_v58 = vrot.slane %v1322_v25, %v1336_v48 }
 0x2a7   :  { %v675_v2 = vsel %vm615_vm2, %v674_v42, %v670_v27 }
 0x2a8   :  { %v1324_v43 = vpop.xlane.xlu1 %521  ;;  %v1326_v54 = vpop.xlane.xlu0 %515 }
 0x2a9   :  { %v688_v60 = vrot.slane %v1324_v43, %v1338_v3  ;;  %v679_v41 = vrot.slane %v1326_v54, %v1342_v26 }
 0x2ab   :  { %v689_v9 = vsel %vm608_vm1, %v688_v60, %v684_v58  ;;  %v680_v29 = vsel %vm622_vm3, %v679_v41, %v675_v2 }
 0x2ac   :  { %v1328_v36 = vpop.xlane.xlu1 %524  ;;  %v1330_v1 = vpop.xlane.xlu0 %530 }
 0x2ad   :  { %v693_v17 = vrot.slane %v1328_v36, %v1340_v51  ;;  %v703_v5 = vrot.slane %v1330_v1, %v1336_v48  ;;  %v758_v36 = vsel %vm757_vm4, %v642_v59, %v623_v10 }
 0x2ae   :  { %v760_v46 = vsel %vm759_vm5, %v661_v63, %v758_v36 }
 0x2af   :  { %v694_v43 = vsel %vm615_vm2, %v693_v17, %v689_v9 }
 0x2b0   :  { %v1332_v24 = vpop.xlane.xlu1 %533  ;;  %v1334_v23 = vpop.xlane.xlu0 %527 }
 0x2b1   :  { %v707_v34 = vrot.slane %v1332_v24, %v1338_v3  ;;  %v698_v4 = vrot.slane %v1334_v23, %v1342_v26 }
 0x2b3   :  { %v708_v54 = vsel %vm608_vm1, %v707_v34, %v703_v5  ;;  %v699_v1 = vsel %vm622_vm3, %v698_v4, %v694_v43 }
 0x2b4   :  { %v1344_v6 = vpop.xlane.xlu1 %536  ;;  %v1346_v20 = vpop.xlane.xlu0 %542 }
 0x2b5   :  { %v712_v35 = vrot.slane %v1344_v6, %v1340_v51  ;;  %v722_v7 = vrot.slane %v1346_v20, %v1336_v48 }
 0x2b7   :  { %v713_v19 = vsel %vm615_vm2, %v712_v35, %v708_v54 }
 0x2b8   :  { %v546_v0 = vpop.xlane.xlu1 %545  ;;  %v540_v49 = vpop.xlane.xlu0 %539 }
 0x2b9   :  { %v726_v39 = vrot.slane %v546_v0, %v1338_v3  ;;  %v717_v55 = vrot.slane %v540_v49, %v1342_v26 }
 0x2bb   :  { %v727_v32 = vsel %vm608_vm1, %v726_v39, %v722_v7  ;;  %v718_v40 = vsel %vm622_vm3, %v717_v55, %v713_v19 }
 0x2bc   :  { %v549_v52 = vpop.xlane.xlu1 %548  ;;  %v555_v22 = vpop.xlane.xlu0 %554 }
 0x2bd   :  { %v731_v44 = vrot.slane %v549_v52, %v1340_v51  ;;  %v741_v23 = vrot.slane %v555_v22, %v1336_v48 }
 0x2bf   :  { %v732_v24 = vsel %vm615_vm2, %v731_v44, %v727_v32 }
 0x2c0   :  { %v558_v61 = vpop.xlane.xlu1 %557  ;;  %v552_v18 = vpop.xlane.xlu0 %551 }
 0x2c1   :  { %v736_v25 = vrot.slane %v552_v18, %v1342_v26  ;;  %v745_v62 = vrot.slane %v558_v61, %v1338_v3  ;;  %v762_v3 = vsel %vm761_vm6, %v680_v29, %v760_v46 }
 0x2c2   :  { %v764_v30 = vsel %vm763_vm7, %v699_v1, %v762_v3 }
 0x2c3   :  { %v737_v12 = vsel %vm622_vm3, %v736_v25, %v732_v24  ;;  %v746_v13 = vsel %vm608_vm1, %v745_v62, %v741_v23  ;;  %v766_v48 = vsel %vm765_vm8, %v718_v40, %v764_v30 }
 0x2c4   :  { %v561_v6 = vpop.xlane.xlu1 %560  ;;  %v564_v20 = vpop.xlane.xlu0 %563  ;;  %v768_v53 = vsel %vm767_vm9, %v737_v12, %v766_v48 }
 0x2c5   :  { %v750_v31 = vrot.slane %v561_v6, %v1340_v51  ;;  %v755_v11 = vrot.slane %v564_v20, %v1342_v26 }
 0x2c7   :  { %v751_v45 = vsel %vm615_vm2, %v750_v31, %v746_v13 }
 0x2c8   :  { %v756_v50 = vsel %vm622_vm3, %v755_v11, %v751_v45 }
 0x2c9   :  { %v770_v51 = vsel %vm769_vm10, %v756_v50, %v768_v53 }
 0x2ca   :  { %773 = vst.msk [vmem:[#allocation2] sm:$0xff] %vm772_vm11, %v770_v51 }
 0x2cb   :  { %899 = shalt.err (!%p896_p4)
}
 0x2cc   :  { %s900_s14 = scalar_lea.hbm %s1435_s2, 128 }
 0x2cd   :  { %p901_p5 = scmp.ne.s32.totalorder %s1435_s2, %s900_s14  ;;  %p904_p6 = scmp.lt.u32.totalorder %s900_s14, %s1435_s2 }
 0x2cf   :  { %p906_p7 = pnand %p904_p6, %p901_p5 }
 0x2d1   :  { %909 = shalt.err (!%p906_p7)
}
 0x2d2   :  { %783 = dma.vmem_to_hbm [thread:$0]  %s781_s1, 128, %s1435_s2, [#allocation3]  }
 0x2d3   :  { %910 = dma.done.wait [#allocation3], 128  }
 0x2d4   :  { %911 = vsyncadd [#allocation3], 4294967168 }
 0x2d5   :  { %787 = vsyncpa [#allocation3], 1 }

</bundles_post_ra>
